<compile_context>
chip_gen: v7x
topology: tpu7x:2x2x1
jax: 0.10.0
libtpu: 0.0.40
codegen_flags: <defaults>
</compile_context>

<pallas_src>
import functools
import math

import jax
import jax.numpy as jnp
import numpy as np
from jax.experimental import pallas as pl
from jax.experimental.pallas import tpu as pltpu


def _round_up(x: int, m: int) -> int:
    return ((x + m - 1) // m) * m


def _cdiv(a: int, b: int) -> int:
    return (a + b - 1) // b


def _mhdpa_kernel(q_ref, kt_ref, vt_ref, wq_ref, wk_ref, wv_ref, sev_ref,
                  wf_ref, gamma_ref, beta_ref, o_ref, *, eps):
    """One grid step == one tile of TB batch rows. Everything lives in VMEM."""
    TB, P, d_k_in = kt_ref.shape
    d_v_in = vt_ref.shape[2]
    W = wq_ref.shape[1]                       # padded head width (>= HdQK+HdV)

    # --- head projections on the MXU (bf16 operands, f32 accumulate) -------
    q = q_ref[...].astype(jnp.bfloat16)                        # [TB, d_q_in]
    kt = kt_ref[...].reshape(TB * P, d_k_in)                   # [TB*P, d_k_in]
    vt = vt_ref[...].reshape(TB * P, d_v_in)                   # [TB*P, d_v_in]

    qp = jnp.dot(q, wq_ref[...], preferred_element_type=jnp.float32)      # [TB, W]
    kvp = (jnp.dot(kt, wk_ref[...], preferred_element_type=jnp.float32)
           + jnp.dot(vt, wv_ref[...], preferred_element_type=jnp.float32))  # [TB*P, W]
    kvp3 = kvp.reshape(TB, P, W)              # lane-dense [kp | vp] layout

    # energy[b,p,h] = sum_d qp[b,h*d_qk+d]*kp[b,p,h*d_qk+d], computed as a
    # matmul with the constant scatter matrix `sev` (1/sqrt(d_qk) folded in),
    # which also replicates head h's energy across that head's d_v lanes in
    # the V half of the 128-wide layout.  Unused lanes are zero and are
    # annihilated later by wf_pad's zero rows.
    prod = (kvp3 * qp[:, None, :]).reshape(TB * P, W).astype(jnp.bfloat16)
    logits = jnp.dot(prod, sev_ref[...],
                     preferred_element_type=jnp.float32).reshape(TB, P, W)

    # Softmax over the P axis (sublane reductions), reciprocal folded past
    # the P-reduction (single [TB,P,W] multiply; recip multiply is [TB,W]).
    m = jnp.max(logits, axis=1, keepdims=True)                 # [TB, 1, W]
    e = jnp.exp(logits - m)                                    # [TB, P, W]
    denom = jnp.sum(e, axis=1)                                 # [TB, W]
    weighted = jnp.sum(e * kvp3, axis=1)                       # [TB, W]
    attended = weighted * pl.reciprocal(denom, approx=True)    # EUP recip

    # final_linear (bias=False).  wf_pad's zero rows kill the K-half lanes.
    out = jnp.dot(attended.astype(jnp.bfloat16), wf_ref[...],
                  preferred_element_type=jnp.float32)          # [TB, d_out]

    # LayerNorm(d_out, eps=1e-6)
    mean = jnp.mean(out, axis=-1, keepdims=True)
    var = jnp.mean((out - mean) ** 2, axis=-1, keepdims=True)
    normed = (out - mean) * jax.lax.rsqrt(var + eps)
    o_ref[...] = normed * gamma_ref[...] + beta_ref[...]
    # TODO(synk): dropout_p > 0 (nn.Dropout) and the optional attention mask
    # are not implemented; module defaults (dropout_p=0.0, mask=None) only.


def mhdpa_pallas(Q, K, V, params, num_heads, eps=1e-6, block_b=256):
    """Q: [B, d_q_in], K: [B, d_k_in, P], V: [B, d_v_in, P] (PyTorch layout)."""
    wq_t, wk_t, wv_t, wf_t, gamma, beta = params
    B, d_q_in = Q.shape
    _, d_k_in, P = K.shape
    _, d_v_in, _ = V.shape
    HdQK = wq_t.shape[1]
    HdV = wv_t.shape[1]
    d_qk = HdQK // num_heads
    d_v = HdV // num_heads
    d_out = wf_t.shape[1]
    W = _round_up(HdQK + HdV, 128)            # lane-dense packed head width

    # ---- batch tiling: guarantee >=2 grid steps whenever B > 8 so the
    # "parallel" axis actually shards across both v7x TensorCores. ----------
    B8 = _round_up(B, 8)
    TB = max(8, min(_round_up(block_b, 8), _round_up(_cdiv(B8, 2), 8)))
    B_pad = _round_up(B, TB)
    # TB=256 keeps per-tile f32 intermediates at ~4 MB; if block_b is raised
    # past ~512 (v6e sweep), add pltpu.CompilerParams(vmem_limit_bytes=...)
    # so v7x's smaller VMEM is budgeted explicitly.

    # ---- layout plumbing: transpose + bf16 cast + batch pad fuse into one
    # producer pass per tensor; no concatenate copy (K and V enter separately).
    pad_b = B_pad - B
    Kt = jnp.pad(jnp.transpose(K, (0, 2, 1)).astype(jnp.bfloat16),
                 ((0, pad_b), (0, 0), (0, 0)))                 # [B_pad, P, d_k_in]
    Vt = jnp.pad(jnp.transpose(V, (0, 2, 1)).astype(jnp.bfloat16),
                 ((0, pad_b), (0, 0), (0, 0)))                 # [B_pad, P, d_v_in]
    Q_in = jnp.pad(Q.astype(jnp.float32), ((0, pad_b), (0, 0)))  # tiny DMA, cast in-kernel

    # ---- padded constant weights (bf16 MXU operands) ----------------------
    wq_pad = jnp.zeros((d_q_in, W), jnp.float32).at[:, :HdQK].set(wq_t)
    wk_pad = jnp.zeros((d_k_in, W), jnp.float32).at[:, :HdQK].set(wk_t)
    wv_pad = jnp.zeros((d_v_in, W), jnp.float32).at[:, HdQK:HdQK + HdV].set(wv_t)
    wf_pad = jnp.zeros((W, d_out), jnp.float32).at[HdQK:HdQK + HdV, :].set(wf_t)

    # energy scatter matrix: sums kp*qp over d_qk per head and replicates the
    # result across that head's d_v slots in the V half; 1/sqrt(d_qk) folded in
    # (exactly representable in bf16 for power-of-two d_qk).
    sev_np = np.zeros((W, W), np.float32)
    scale = 1.0 / math.sqrt(d_qk)
    for h in range(num_heads):
        sev_np[h * d_qk:(h + 1) * d_qk,
               HdQK + h * d_v:HdQK + (h + 1) * d_v] = scale
    sev = jnp.asarray(sev_np)

    wq_pad, wk_pad, wv_pad, wf_pad, sev = (
        a.astype(jnp.bfloat16) for a in (wq_pad, wk_pad, wv_pad, wf_pad, sev))

    gamma2 = gamma.reshape(1, d_out).astype(jnp.float32)
    beta2 = beta.reshape(1, d_out).astype(jnp.float32)

    kernel = functools.partial(_mhdpa_kernel, eps=eps)

    out = pl.pallas_call(
        kernel,
        out_shape=jax.ShapeDtypeStruct((B_pad, d_out), jnp.float32),
        grid=(B_pad // TB,),
        in_specs=[
            pl.BlockSpec((TB, d_q_in), lambda b: (b, 0)),
            pl.BlockSpec((TB, P, d_k_in), lambda b: (b, 0, 0)),
            pl.BlockSpec((TB, P, d_v_in), lambda b: (b, 0, 0)),
            pl.BlockSpec((d_q_in, W), lambda b: (0, 0)),
            pl.BlockSpec((d_k_in, W), lambda b: (0, 0)),
            pl.BlockSpec((d_v_in, W), lambda b: (0, 0)),
            pl.BlockSpec((W, W), lambda b: (0, 0)),
            pl.BlockSpec((W, d_out), lambda b: (0, 0)),
            pl.BlockSpec((1, d_out), lambda b: (0, 0)),
            pl.BlockSpec((1, d_out), lambda b: (0, 0)),
        ],
        out_specs=pl.BlockSpec((TB, d_out), lambda b: (b, 0)),
        compiler_params=pltpu.CompilerParams(
            dimension_semantics=("parallel",)),
    )(Q_in, Kt, Vt, wq_pad, wk_pad, wv_pad, sev, wf_pad, gamma2, beta2)
    return out[:B]


def mhdpa_reference(Q, K, V, params, num_heads, eps=1e-6):
    """Pure-JAX f32 replica of the PyTorch forward, for verification."""
    wq_t, wk_t, wv_t, wf_t, gamma, beta = params
    B = Q.shape[0]
    Qp = Q @ wq_t                                   # [B, H*d_qk]
    Kp = jnp.einsum('bip,io->bop', K, wk_t)         # [B, H*d_qk, P]
    Vp = jnp.einsum('bip,io->bop', V, wv_t)         # [B, H*d_v, P]
    H = num_heads
    d_qk = Qp.shape[1] // H
    d_v = Vp.shape[1] // H
    P = K.shape[2]
    Qh = Qp.reshape(B * H, d_qk)
    Kh = Kp.reshape(B * H, d_qk, P)
    Vh = Vp.reshape(B * H, d_v, P)
    energy = jnp.einsum('bd,bdp->bp', Qh, Kh)
    attn = jax.nn.softmax(energy * (1.0 / math.sqrt(d_qk)), axis=-1)
    att = jnp.einsum('bp,bdp->bd', attn, Vh).reshape(B, H * d_v)
    out = att @ wf_t
    mean = out.mean(-1, keepdims=True)
    var = ((out - mean) ** 2).mean(-1, keepdims=True)
    return (out - mean) / jnp.sqrt(var + eps) * gamma + beta


if __name__ == "__main__":
    P = 8
    d_q_in, d_k_in, d_v_in = 32, 24, 24
    d_qk, d_v, num_heads, d_out = 16, 16, 4, 32

    key = jax.random.PRNGKey(0)
    ks = jax.random.split(key, 8)

    def lin_weight_t(k, d_in, d_o):
        # nn.Linear weight is [d_o, d_in]; init uniform(-1/sqrt(d_in), 1/sqrt(d_in)),
        # stored transposed (in, out) for the kernel.
        bound = 1.0 / math.sqrt(d_in)
        w = jax.random.uniform(k, (d_o, d_in), jnp.float32, -bound, bound)
        return w.T

    wq_t = lin_weight_t(ks[3], d_q_in, d_qk * num_heads)
    wk_t = lin_weight_t(ks[4], d_k_in, d_qk * num_heads)
    wv_t = lin_weight_t(ks[5], d_v_in, d_v * num_heads)
    wf_t = lin_weight_t(ks[6], d_v * num_heads, d_out)
    gamma = jnp.ones((d_out,), jnp.float32)   # LayerNorm weight init
    beta = jnp.zeros((d_out,), jnp.float32)   # LayerNorm bias init
    params = (wq_t, wk_t, wv_t, wf_t, gamma, beta)

    # Reference is pure f32; the kernel uses bf16 MXU operands and the approx
    # EUP reciprocal, and the final LayerNorm divides by a small row-std,
    # amplifying those rounding errors.  Structural errors would be O(1),
    # so this tolerance still catches any semantic mistake.
    TOL = dict(rtol=2e-2, atol=5e-2)

    # Case 1: tiny batch (B=2) -> single padded tile.
    B = 2
    Q = jax.random.normal(ks[0], (B, d_q_in), jnp.float32)
    K = jax.random.normal(ks[1], (B, d_k_in, P), jnp.float32)
    V = jax.random.normal(ks[2], (B, d_v_in, P), jnp.float32)
    out = jax.block_until_ready(mhdpa_pallas(Q, K, V, params, num_heads))
    ref = mhdpa_reference(Q, K, V, params, num_heads)
    np.testing.assert_allclose(np.asarray(out), np.asarray(ref), **TOL)

    # Case 2: B=11 -> TB=8, two grid steps (exercises megacore sharding path)
    # plus batch padding to 16.
    B2 = 11
    Q2 = jax.random.normal(ks[7], (B2, d_q_in), jnp.float32)
    K2 = jax.random.normal(ks[1], (B2, d_k_in, P), jnp.float32)
    V2 = jax.random.normal(ks[2], (B2, d_v_in, P), jnp.float32)
    out2 = jax.block_until_ready(mhdpa_pallas(Q2, K2, V2, params, num_heads))
    ref2 = mhdpa_reference(Q2, K2, V2, params, num_heads)
    np.testing.assert_allclose(np.asarray(out2), np.asarray(ref2), **TOL)

    print("KERNEL_OK")
</pallas_src>

<mosaic_0001>
module attributes {stable_mosaic.version = 11 : i64} {
  func.func @_mhdpa_kernel(%arg0: i32, %arg1: memref<8x32xf32, #tpu.memory_space<vmem>>, %arg2: memref<8x8x24xbf16, #tpu.memory_space<vmem>>, %arg3: memref<8x8x24xbf16, #tpu.memory_space<vmem>>, %arg4: memref<32x128xbf16, #tpu.memory_space<vmem>>, %arg5: memref<24x128xbf16, #tpu.memory_space<vmem>>, %arg6: memref<24x128xbf16, #tpu.memory_space<vmem>>, %arg7: memref<128x128xbf16, #tpu.memory_space<vmem>>, %arg8: memref<128x32xbf16, #tpu.memory_space<vmem>>, %arg9: memref<1x32xf32, #tpu.memory_space<vmem>>, %arg10: memref<1x32xf32, #tpu.memory_space<vmem>>, %arg11: memref<8x32xf32, #tpu.memory_space<vmem>>) attributes {dimension_semantics = [#tpu.dimension_semantics<parallel>], iteration_bounds = array<i64: 1>, scalar_prefetch = 0 : i64, scratch_operands = 0 : i64, tpu.core_type = #tpu.core_type<tc>, window_params = [{transform_indices = @transform_0, window_bounds = array<i64: 8, 32>}, {transform_indices = @transform_1, window_bounds = array<i64: 8, 8, 24>}, {transform_indices = @transform_2, window_bounds = array<i64: 8, 8, 24>}, {pipeline_mode = #tpu.pipeline_mode<synchronous>, transform_indices = @transform_3, window_bounds = array<i64: 32, 128>}, {pipeline_mode = #tpu.pipeline_mode<synchronous>, transform_indices = @transform_4, window_bounds = array<i64: 24, 128>}, {pipeline_mode = #tpu.pipeline_mode<synchronous>, transform_indices = @transform_5, window_bounds = array<i64: 24, 128>}, {pipeline_mode = #tpu.pipeline_mode<synchronous>, transform_indices = @transform_6, window_bounds = array<i64: 128, 128>}, {pipeline_mode = #tpu.pipeline_mode<synchronous>, transform_indices = @transform_7, window_bounds = array<i64: 128, 32>}, {pipeline_mode = #tpu.pipeline_mode<synchronous>, transform_indices = @transform_8, window_bounds = array<i64: 1, 32>}, {pipeline_mode = #tpu.pipeline_mode<synchronous>, transform_indices = @transform_9, window_bounds = array<i64: 1, 32>}, {transform_indices = @transform_10, window_bounds = array<i64: 8, 32>}]} {
    %c0 = arith.constant 0 : index
    %c0_0 = arith.constant 0 : index
    %0 = vector.load %arg1[%c0, %c0_0] : memref<8x32xf32, #tpu.memory_space<vmem>>, vector<8x32xf32>
    %1 = arith.truncf %0 : vector<8x32xf32> to vector<8x32xbf16>
    %c0_1 = arith.constant 0 : index
    %c0_2 = arith.constant 0 : index
    %c0_3 = arith.constant 0 : index
    %2 = vector.load %arg2[%c0_1, %c0_2, %c0_3] : memref<8x8x24xbf16, #tpu.memory_space<vmem>>, vector<8x8x24xbf16>
    %3 = vector.shape_cast %2 : vector<8x8x24xbf16> to vector<64x24xbf16>
    %c0_4 = arith.constant 0 : index
    %c0_5 = arith.constant 0 : index
    %c0_6 = arith.constant 0 : index
    %4 = vector.load %arg3[%c0_4, %c0_5, %c0_6] : memref<8x8x24xbf16, #tpu.memory_space<vmem>>, vector<8x8x24xbf16>
    %5 = vector.shape_cast %4 : vector<8x8x24xbf16> to vector<64x24xbf16>
    %c0_7 = arith.constant 0 : index
    %c0_8 = arith.constant 0 : index
    %6 = vector.load %arg4[%c0_7, %c0_8] : memref<32x128xbf16, #tpu.memory_space<vmem>>, vector<32x128xbf16>
    %cst = arith.constant dense<0.000000e+00> : vector<8x128xf32>
    %7 = tpu.matmul %1, %6, %cst {dimension_numbers = #tpu.dot_dimension_numbers<[1], [0], [0], [1], [0, 0, 1, 1], [], []>} : vector<8x32xbf16>, vector<32x128xbf16>, vector<8x128xf32> -> vector<8x128xf32>
    %c0_9 = arith.constant 0 : index
    %c0_10 = arith.constant 0 : index
    %8 = vector.load %arg5[%c0_9, %c0_10] : memref<24x128xbf16, #tpu.memory_space<vmem>>, vector<24x128xbf16>
    %cst_11 = arith.constant dense<0.000000e+00> : vector<64x128xf32>
    %9 = tpu.matmul %3, %8, %cst_11 {dimension_numbers = #tpu.dot_dimension_numbers<[1], [0], [0], [1], [0, 0, 1, 1], [], []>} : vector<64x24xbf16>, vector<24x128xbf16>, vector<64x128xf32> -> vector<64x128xf32>
    %c0_12 = arith.constant 0 : index
    %c0_13 = arith.constant 0 : index
    %10 = vector.load %arg6[%c0_12, %c0_13] : memref<24x128xbf16, #tpu.memory_space<vmem>>, vector<24x128xbf16>
    %cst_14 = arith.constant dense<0.000000e+00> : vector<64x128xf32>
    %11 = tpu.matmul %5, %10, %cst_14 {dimension_numbers = #tpu.dot_dimension_numbers<[1], [0], [0], [1], [0, 0, 1, 1], [], []>} : vector<64x24xbf16>, vector<24x128xbf16>, vector<64x128xf32> -> vector<64x128xf32>
    %12 = arith.addf %9, %11 : vector<64x128xf32>
    %13 = vector.shape_cast %12 : vector<64x128xf32> to vector<8x8x128xf32>
    %14 = vector.shape_cast %7 : vector<8x128xf32> to vector<8x1x128xf32>
    %15 = vector.broadcast %14 : vector<8x1x128xf32> to vector<8x8x128xf32>
    %16 = arith.mulf %13, %15 : vector<8x8x128xf32>
    %17 = vector.shape_cast %16 : vector<8x8x128xf32> to vector<64x128xf32>
    %18 = arith.truncf %17 : vector<64x128xf32> to vector<64x128xbf16>
    %c0_15 = arith.constant 0 : index
    %c0_16 = arith.constant 0 : index
    %19 = vector.load %arg7[%c0_15, %c0_16] : memref<128x128xbf16, #tpu.memory_space<vmem>>, vector<128x128xbf16>
    %cst_17 = arith.constant dense<0.000000e+00> : vector<64x128xf32>
    %20 = tpu.matmul %18, %19, %cst_17 {dimension_numbers = #tpu.dot_dimension_numbers<[1], [0], [0], [1], [0, 0, 1, 1], [], []>} : vector<64x128xbf16>, vector<128x128xbf16>, vector<64x128xf32> -> vector<64x128xf32>
    %21 = vector.shape_cast %20 : vector<64x128xf32> to vector<8x8x128xf32>
    %cst_18 = arith.constant dense<0xFF800000> : vector<8x128xf32>
    %22 = vector.multi_reduction <maximumf>, %21, %cst_18 [1] : vector<8x8x128xf32> to vector<8x128xf32>
    %23 = vector.shape_cast %22 : vector<8x128xf32> to vector<8x1x128xf32>
    %24 = vector.broadcast %23 : vector<8x1x128xf32> to vector<8x8x128xf32>
    %25 = arith.subf %21, %24 : vector<8x8x128xf32>
    %26 = math.exp %25 : vector<8x8x128xf32>
    %cst_19 = arith.constant dense<0.000000e+00> : vector<8x128xf32>
    %27 = vector.multi_reduction <add>, %26, %cst_19 [1] : vector<8x8x128xf32> to vector<8x128xf32>
    %28 = arith.mulf %26, %13 : vector<8x8x128xf32>
    %cst_20 = arith.constant dense<0.000000e+00> : vector<8x128xf32>
    %29 = vector.multi_reduction <add>, %28, %cst_20 [1] : vector<8x8x128xf32> to vector<8x128xf32>
    %30 = tpu.reciprocal %27 {approx = true} : vector<8x128xf32> -> vector<8x128xf32>
    %31 = arith.mulf %29, %30 : vector<8x128xf32>
    %32 = arith.truncf %31 : vector<8x128xf32> to vector<8x128xbf16>
    %c0_21 = arith.constant 0 : index
    %c0_22 = arith.constant 0 : index
    %33 = vector.load %arg8[%c0_21, %c0_22] : memref<128x32xbf16, #tpu.memory_space<vmem>>, vector<128x32xbf16>
    %cst_23 = arith.constant dense<0.000000e+00> : vector<8x32xf32>
    %34 = tpu.matmul %32, %33, %cst_23 {dimension_numbers = #tpu.dot_dimension_numbers<[1], [0], [0], [1], [0, 0, 1, 1], [], []>} : vector<8x128xbf16>, vector<128x32xbf16>, vector<8x32xf32> -> vector<8x32xf32>
    %cst_24 = arith.constant dense<0.000000e+00> : vector<8xf32>
    %35 = vector.multi_reduction <add>, %34, %cst_24 [1] : vector<8x32xf32> to vector<8xf32>
    %36 = vector.shape_cast %35 : vector<8xf32> to vector<8x1xf32>
    %cst_25 = arith.constant 3.200000e+01 : f32
    %37 = vector.broadcast %cst_25 : f32 to vector<8x1xf32>
    %38 = arith.divf %36, %37 : vector<8x1xf32>
    %39 = vector.broadcast %38 : vector<8x1xf32> to vector<8x32xf32>
    %40 = arith.subf %34, %39 : vector<8x32xf32>
    %41 = arith.mulf %40, %40 : vector<8x32xf32>
    %cst_26 = arith.constant dense<0.000000e+00> : vector<8xf32>
    %42 = vector.multi_reduction <add>, %41, %cst_26 [1] : vector<8x32xf32> to vector<8xf32>
    %43 = vector.shape_cast %42 : vector<8xf32> to vector<8x1xf32>
    %cst_27 = arith.constant 3.200000e+01 : f32
    %44 = vector.broadcast %cst_27 : f32 to vector<8x1xf32>
    %45 = arith.divf %43, %44 : vector<8x1xf32>
    %46 = vector.broadcast %38 : vector<8x1xf32> to vector<8x32xf32>
    %47 = arith.subf %34, %46 : vector<8x32xf32>
    %cst_28 = arith.constant 9.99999997E-7 : f32
    %48 = vector.broadcast %cst_28 : f32 to vector<8x1xf32>
    %49 = arith.addf %45, %48 : vector<8x1xf32>
    %50 = math.rsqrt %49 : vector<8x1xf32>
    %51 = vector.broadcast %50 : vector<8x1xf32> to vector<8x32xf32>
    %52 = arith.mulf %47, %51 : vector<8x32xf32>
    %c0_29 = arith.constant 0 : index
    %c0_30 = arith.constant 0 : index
    %53 = vector.load %arg9[%c0_29, %c0_30] : memref<1x32xf32, #tpu.memory_space<vmem>>, vector<1x32xf32>
    %54 = vector.broadcast %53 : vector<1x32xf32> to vector<8x32xf32>
    %55 = arith.mulf %52, %54 : vector<8x32xf32>
    %c0_31 = arith.constant 0 : index
    %c0_32 = arith.constant 0 : index
    %56 = vector.load %arg10[%c0_31, %c0_32] : memref<1x32xf32, #tpu.memory_space<vmem>>, vector<1x32xf32>
    %57 = vector.broadcast %56 : vector<1x32xf32> to vector<8x32xf32>
    %58 = arith.addf %55, %57 : vector<8x32xf32>
    %c0_33 = arith.constant 0 : index
    %c0_34 = arith.constant 0 : index
    %59 = vector.load %arg11[%c0_33, %c0_34] : memref<8x32xf32, #tpu.memory_space<vmem>>, vector<8x32xf32>
    tpu.vector_store %arg11[%c0_33, %c0_34], %58 {strides = array<i32>} : memref<8x32xf32, #tpu.memory_space<vmem>>, vector<8x32xf32>,
    return
  }
  func.func @transform_0(%arg0: i32) -> (i32, i32) {
    %c0_i32 = arith.constant 0 : i32
    %c0_i32_0 = arith.constant 0 : i32
    return %arg0, %c0_i32 : i32, i32
  }
  func.func @transform_1(%arg0: i32) -> (i32, i32, i32) {
    %c0_i32 = arith.constant 0 : i32
    %c0_i32_0 = arith.constant 0 : i32
    %c0_i32_1 = arith.constant 0 : i32
    return %arg0, %c0_i32, %c0_i32_0 : i32, i32, i32
  }
  func.func @transform_2(%arg0: i32) -> (i32, i32, i32) {
    %c0_i32 = arith.constant 0 : i32
    %c0_i32_0 = arith.constant 0 : i32
    %c0_i32_1 = arith.constant 0 : i32
    return %arg0, %c0_i32, %c0_i32_0 : i32, i32, i32
  }
  func.func @transform_3(%arg0: i32) -> (i32, i32) {
    %c0_i32 = arith.constant 0 : i32
    %c0_i32_0 = arith.constant 0 : i32
    %c0_i32_1 = arith.constant 0 : i32
    return %c0_i32, %c0_i32_0 : i32, i32
  }
  func.func @transform_4(%arg0: i32) -> (i32, i32) {
    %c0_i32 = arith.constant 0 : i32
    %c0_i32_0 = arith.constant 0 : i32
    %c0_i32_1 = arith.constant 0 : i32
    return %c0_i32, %c0_i32_0 : i32, i32
  }
  func.func @transform_5(%arg0: i32) -> (i32, i32) {
    %c0_i32 = arith.constant 0 : i32
    %c0_i32_0 = arith.constant 0 : i32
    %c0_i32_1 = arith.constant 0 : i32
    return %c0_i32, %c0_i32_0 : i32, i32
  }
  func.func @transform_6(%arg0: i32) -> (i32, i32) {
    %c0_i32 = arith.constant 0 : i32
    %c0_i32_0 = arith.constant 0 : i32
    %c0_i32_1 = arith.constant 0 : i32
    return %c0_i32, %c0_i32_0 : i32, i32
  }
  func.func @transform_7(%arg0: i32) -> (i32, i32) {
    %c0_i32 = arith.constant 0 : i32
    %c0_i32_0 = arith.constant 0 : i32
    %c0_i32_1 = arith.constant 0 : i32
    return %c0_i32, %c0_i32_0 : i32, i32
  }
  func.func @transform_8(%arg0: i32) -> (i32, i32) {
    %c0_i32 = arith.constant 0 : i32
    %c0_i32_0 = arith.constant 0 : i32
    %c0_i32_1 = arith.constant 0 : i32
    return %c0_i32, %c0_i32_0 : i32, i32
  }
  func.func @transform_9(%arg0: i32) -> (i32, i32) {
    %c0_i32 = arith.constant 0 : i32
    %c0_i32_0 = arith.constant 0 : i32
    %c0_i32_1 = arith.constant 0 : i32
    return %c0_i32, %c0_i32_0 : i32, i32
  }
  func.func @transform_10(%arg0: i32) -> (i32, i32) {
    %c0_i32 = arith.constant 0 : i32
    %c0_i32_0 = arith.constant 0 : i32
    return %arg0, %c0_i32 : i32, i32
  }
}

</mosaic_0001>

<bundles_post_ra>
// kernel: tpu_custom_call.1
= control target key start
LH: loop header
LB: loop body
LE: loop exit
PB: predicated region body
PF: predicated region fallthrough
CT: control target
= control target key end

     0   :  { %15 = vsyncpa [#allocation3], 0  ;;  %s1678_s0 = inlined_call_operand.hbm [shape: f32[8,32], index: 0, kind: input, shape index: {}]   ;;  %s1679_s1 = inlined_call_operand.vmem [shape: bf16[8,8,24], index: 1, kind: input, shape index: {}]   ;;  %s1680_s2 = inlined_call_operand.hbm [shape: bf16[8,8,24], index: 2, kind: input, shape index: {}]   ;;  %s1681_s3 = inlined_call_operand.hbm [shape: bf16[32,128], index: 3, kind: input, shape index: {}]   ;;  %s1682_s4 = inlined_call_operand.hbm [shape: bf16[24,128], index: 4, kind: input, shape index: {}]   ;;  %s1683_s5 = inlined_call_operand.hbm [shape: bf16[24,128], index: 5, kind: input, shape index: {}]   ;;  %s1684_s6 = inlined_call_operand.vmem [shape: bf16[128,128], index: 6, kind: input, shape index: {}]   ;;  %s1685_s7 = inlined_call_operand.vmem [shape: bf16[128,32], index: 7, kind: input, shape index: {}]   ;;  %s1686_s8 = inlined_call_operand.vmem [shape: f32[1,32], index: 8, kind: input, shape index: {}]   ;;  %s1687_s9 = inlined_call_operand.vmem [shape: f32[1,32], index: 9, kind: input, shape index: {}]   ;;  %s1688_s10 = inlined_call_operand.hbm [shape: f32[8,32], index: 10, kind: output, shape index: {}]  }
   0x1   :  { %16 = vsyncpa [#allocation6], 0 }
   0x2   :  { %17 = vsyncpa [#allocation9], 0 }
   0x3   :  { %18 = vsyncpa [#allocation4], 0  ;;  %s1400_s13 = smov [#allocation5]   ;;  %s1260_s17 = scalar_lea.hbm %s1680_s2, 512 }
   0x4   :  { %s36_s14 = sshll.u32 %s1400_s13, 4  ;;  %p1261_p0 = scmp.ne.s32.totalorder %s1680_s2, %s1260_s17  ;;  %s37_s14 = int_to_ptr.vmem [resolvable:$true] %s36_s14 }
   0x5   :  { %p1264_p1 = scmp.lt.u32.totalorder %s1260_s17, %s1680_s2 }
   0x7   :  { %p1266_p2 = pnand %p1264_p1, %p1261_p0 }
   0x9   :  { %1269 = shalt.err (!%p1266_p2)
}
   0xa   :  { %s1270_s22 = scalar_lea.vmem %s37_s14, 512  ;;  %p1275_p4 = scmp.lt.s32.totalorder %s37_s14, %s37_s14 }
   0xb   :  { %p1271_p3 = scmp.ne.s32.totalorder %s37_s14, %s1270_s22  ;;  %p1276_p5 = scmp.lt.s32.totalorder %s1270_s22, %s1270_s22 }
   0xd   :  { %p1277_p6 = por %p1276_p5, %p1275_p4 }
   0xf   :  { %p1278_p7 = pnand %p1277_p6, %p1271_p3 }
  0x11   :  { %1281 = shalt.err (!%p1278_p7)
}
  0x12   :  { %s1401_s23 = smov 64   ;;  %s1402_s24 = smov 4  }
  0x13   :  { %42 = dma.hbm_to_vmem [thread:$0]  %s1680_s2, 512, %s37_s14, [#allocation6], %s1401_s23, %s1401_s23, %s1402_s24  }
  0x14   :  { %s1403_s27 = smov [#allocation8]   ;;  %s1404_s29 = smov [#allocation2]  }
  0x15   :  { %s60_s28 = sshll.u32 %s1403_s27, 4  ;;  %s25_s30 = sshll.u32 %s1404_s29, 4  ;;  %s61_s28 = int_to_ptr.vmem [resolvable:$true] %s60_s28  ;;  %s26_s30 = int_to_ptr.vmem [resolvable:$true] %s25_s30 }
  0x16   :  { %s1282_s13 = scalar_lea.hbm %s1682_s4, 192 }
  0x17   :  { %p1283_p8 = scmp.ne.s32.totalorder %s1682_s4, %s1282_s13  ;;  %p1286_p9 = scmp.lt.u32.totalorder %s1282_s13, %s1682_s4 }
  0x19   :  { %p1288_p10 = pnand %p1286_p9, %p1283_p8 }
  0x1b   :  { %1291 = shalt.err (!%p1288_p10)
}
  0x1c   :  { %s1292_s2 = scalar_lea.vmem %s61_s28, 192  ;;  %p1297_p12 = scmp.lt.s32.totalorder %s61_s28, %s61_s28 }
  0x1d   :  { %p1293_p11 = scmp.ne.s32.totalorder %s61_s28, %s1292_s2  ;;  %p1298_p13 = scmp.lt.s32.totalorder %s1292_s2, %s1292_s2 }
  0x1f   :  { %p1299_p0 = por %p1298_p13, %p1297_p12 }
  0x21   :  { %p1300_p1 = pnand %p1299_p0, %p1293_p11 }
  0x23   :  { %1303 = shalt.err (!%p1300_p1)
}
  0x24   :  { %66 = dma.hbm_to_vmem [thread:$0]  %s1682_s4, 192, %s61_s28, [#allocation9], %s1401_s23, %s1401_s23, %s1402_s24  }
  0x25   :  { %s1304_s22 = scalar_lea.hbm %s1678_s0, 128 }
  0x26   :  { %p1305_p2 = scmp.ne.s32.totalorder %s1678_s0, %s1304_s22  ;;  %p1308_p3 = scmp.lt.u32.totalorder %s1304_s22, %s1678_s0 }
  0x28   :  { %p1310_p4 = pnand %p1308_p3, %p1305_p2 }
  0x2a   :  { %1313 = shalt.err (!%p1310_p4)
}
  0x2b   :  { %s1314_s11 = scalar_lea.vmem %s26_s30, 128  ;;  %p1319_p6 = scmp.lt.s32.totalorder %s26_s30, %s26_s30 }
  0x2c   :  { %p1315_p5 = scmp.ne.s32.totalorder %s26_s30, %s1314_s11  ;;  %p1320_p7 = scmp.lt.s32.totalorder %s1314_s11, %s1314_s11 }
  0x2e   :  { %p1321_p8 = por %p1320_p7, %p1319_p6 }
  0x30   :  { %p1322_p9 = pnand %p1321_p8, %p1315_p5 }
  0x32   :  { %1325 = shalt.err (!%p1322_p9)
}
  0x33   :  { %28 = dma.hbm_to_vmem [thread:$0]  %s1678_s0, 128, %s26_s30, [#allocation3]  }
  0x34   :  { %s1405_s12 = smov [#allocation7]   ;;  %s1406_s15 = smov [#allocation10]  }
  0x35   :  { %s48_s13 = sshll.u32 %s1405_s12, 4  ;;  %s72_s16 = sshll.u32 %s1406_s15, 4  ;;  %s49_s13 = int_to_ptr.vmem [resolvable:$true] %s48_s13  ;;  %s73_s16 = int_to_ptr.vmem [resolvable:$true] %s72_s16 }
  0x36   :  { %s1326_s2 = scalar_lea.hbm %s1681_s3, 256 }
  0x37   :  { %p1327_p10 = scmp.ne.s32.totalorder %s1681_s3, %s1326_s2  ;;  %p1330_p11 = scmp.lt.u32.totalorder %s1326_s2, %s1681_s3 }
  0x39   :  { %p1332_p12 = pnand %p1330_p11, %p1327_p10 }
  0x3b   :  { %1335 = shalt.err (!%p1332_p12)
}
  0x3c   :  { %s1336_s0 = scalar_lea.vmem %s49_s13, 256  ;;  %p1341_p0 = scmp.lt.s32.totalorder %s49_s13, %s49_s13 }
  0x3d   :  { %p1337_p13 = scmp.ne.s32.totalorder %s49_s13, %s1336_s0  ;;  %p1342_p1 = scmp.lt.s32.totalorder %s1336_s0, %s1336_s0 }
  0x3f   :  { %p1343_p2 = por %p1342_p1, %p1341_p0 }
  0x41   :  { %p1344_p3 = pnand %p1343_p2, %p1337_p13 }
  0x43   :  { %1347 = shalt.err (!%p1344_p3)
}
  0x44   :  { %54 = dma.hbm_to_vmem [thread:$0]  %s1681_s3, 256, %s49_s13, [#allocation6], %s1401_s23, %s1401_s23, %s1402_s24  }
  0x45   :  { %s1348_s27 = scalar_lea.hbm %s1683_s5, 192 }
  0x46   :  { %p1349_p4 = scmp.ne.s32.totalorder %s1683_s5, %s1348_s27  ;;  %p1352_p5 = scmp.lt.u32.totalorder %s1348_s27, %s1683_s5 }
  0x48   :  { %p1354_p6 = pnand %p1352_p5, %p1349_p4 }
  0x4a   :  { %1357 = shalt.err (!%p1354_p6)
}
  0x4b   :  { %s1358_s12 = scalar_lea.vmem %s73_s16, 192  ;;  %p1363_p8 = scmp.lt.s32.totalorder %s73_s16, %s73_s16 }
  0x4c   :  { %p1359_p7 = scmp.ne.s32.totalorder %s73_s16, %s1358_s12  ;;  %p1364_p9 = scmp.lt.s32.totalorder %s1358_s12, %s1358_s12 }
  0x4e   :  { %p1365_p10 = por %p1364_p9, %p1363_p8 }
  0x50   :  { %p1366_p11 = pnand %p1365_p10, %p1359_p7 }
  0x52   :  { %1369 = shalt.err (!%p1366_p11)
}
  0x53   :  { %78 = dma.hbm_to_vmem [thread:$0]  %s1683_s5, 192, %s73_s16, [#allocation9], %s1401_s23, %s1401_s23, %s1402_s24  }
  0x54   :  { %1392 = dma.done.wait [#allocation3], 128  }
  0x55   :  { %1393 = vsyncadd [#allocation3], 4294967168 }
  0x56   :  { %1394 = dma.done.wait [#allocation6], 768  }
  0x57   :  { %1395 = vsyncadd [#allocation6], 4294966528 }
  0x58   :  { %1396 = dma.done.wait [#allocation9], 384  }
  0x59   :  { %1397 = vsyncadd [#allocation9], 4294966912  ;;  %v1407_v0 = vmov 0.0   ;;  %vm1408_vm0 = vmmov 0   ;;  %vm229_vm1 = vcmask 1043456   ;;  %v1196_v1 = vld [vmem:[#allocation10] sm:$0xff]   ;;  %v412_v29 = vlaneseq }
  0x5a   :  { %1099 = vmatprep.subr.bf16.mxu0 %v1407_v0  ;;  %1103 = vmatprep.mubr.msk.bf16.mxu0 %vm1408_vm0, %v1407_v0  ;;  %vm216_vm2 = vcmask 195584   ;;  %v1197_v2 = vld [vmem:[#allocation10 + $0x8] ss:$0 sps:$4 sm:$0xff]   ;;  %v1200_v5 = vld [vmem:[#allocation8] sm:$0xff]   ;;  %v1199_v7 = vld [vmem:[#allocation5 + $0x8] sm:$0xff]   ;;  %vm137_vm3 = vcmask 261120  }
  0x5b   :  { %1107 = vmatprep.subr.bf16.mxu1 %v1196_v1  ;;  %v1198_v3 = vld [vmem:[#allocation5] sm:$0xff]   ;;  %v231_v4 = vsel %vm229_vm1, %v1197_v2, 0  ;;  %v1202_v8 = vld [vmem:[#allocation7 + $0x8] sm:$0xff]   ;;  %v103_v9 = vld [vmem:[#allocation2] sm:$0xff]  ;;  %v1409_v27 = vmov 1966171168  }
  0x5c   :  { %1108 = vmatpush3.bf16.msra.mxu1 %v1196_v1  ;;  %1111 = vmatprep.mubr.msk.bf16.mxu1 %vm216_vm2, %v1198_v3  ;;  %v1201_v6 = vld [vmem:[#allocation7] sm:$0xff]   ;;  %v1203_v10 = vld [vmem:[#allocation5 + $0x10] sm:$0xff]   ;;  %v1205_v11 = vld [vmem:[#allocation8 + $0x8] ss:$0 sps:$4 sm:$0xff]   ;;  %v104_v12 = vpack.c.bf16 %v103_v9, %v103_v9  ;;  %v410_v28 = vunpack.c.l.s4 %v1409_v27  ;;  %v413_v31 = vshrl.u32 %v412_v29, 7  ;;  %vm870_vm4 = vcmask 1041409  }
  0x5d   :  { %1183 = vmatprep.subr.msk.bf16.mxu1 %vm229_vm1, %v1197_v2  ;;  %1100 = vmatpush3.bf16.msra.mxu0 %v1201_v6  ;;  %v1204_v13 = vld [vmem:[#allocation5 + $0x18] sm:$0xff]   ;;  %v340_v14 = vsel %vm229_vm1, %v1205_v11, 0  ;;  %v1211_v17 = vld [vmem:[%s1684_s6 + $0x8] sm:$0xff]   ;;  %v1212_v18 = vld [vmem:[%s1684_s6 + $0x10] sm:$0xff]   ;;  %vm872_vm5 = vcmask 1042434   ;;  %vm874_vm6 = vcmask 1043459  }
  0x5e   :  { %1101 = vmatprep.subr.bf16.mxu0 %v1407_v0  ;;  %v1206_v15 = vld [vmem:[%s1679_s1] sm:$0xff]   ;;  %v1207_v19 = vld [vmem:[%s1679_s1 + $0x8] sm:$0xff]   ;;  %v1213_v20 = vld [vmem:[%s1684_s6 + $0x18] sm:$0xff]   ;;  %v411_v30 = vunpack.c.0.s8 %v410_v28  ;;  %v459_v43 = vsub.s32 0, %v413_v31  ;;  %vm876_vm7 = vcmask 1044484   ;;  %vm878_vm8 = vcmask 1045509  }
  0x5f   :  { %v1210_v16 = vld [vmem:[%s1684_s6] sm:$0xff]   ;;  %v1208_v21 = vld [vmem:[%s1679_s1 + $0x10] sm:$0xff]   ;;  %v1209_v22 = vld [vmem:[%s1679_s1 + $0x18] sm:$0xff]   ;;  %vm880_vm9 = vcmask 1046534   ;;  %vm882_vm10 = vcmask 1047559   ;;  %s1410_s26 = smov [#allocation11]  }
  0x60   :  { %1110 = vmatpush3.bf16.msra.mxu1 %v231_v4  ;;  %v1214_v23 = vld [vmem:[%s1684_s6 + $0x20] sm:$0xff]   ;;  %v1215_v24 = vld [vmem:[%s1684_s6 + $0x28] sm:$0xff]   ;;  %v1216_v25 = vld [vmem:[%s1684_s6 + $0x30] sm:$0xff]   ;;  %v414_v32 = vsub.s32 %v411_v30, %v413_v31  ;;  %s1011_s27 = sshll.u32 %s1410_s26, 4  ;;  %s1012_s27 = int_to_ptr.vmem [resolvable:$true] %s1011_s27 }
  0x61   :  { %1119 = vmatprep.subr.bf16.mxu1 %v1200_v5  ;;  %1102 = vmatpush3.bf16.msra.mxu0 %v1202_v8  ;;  %v1217_v26 = vld [vmem:[%s1684_s6 + $0x38] sm:$0xff]   ;;  %s1370_s29 = scalar_lea.vmem %s1012_s27, 128  ;;  %p1375_p13 = scmp.lt.s32.totalorder %s1012_s27, %s1012_s27 }
  0x62   :  { %1131 = vmatprep.subr.bf16.mxu0 %v1210_v16  ;;  %p1371_p12 = scmp.ne.s32.totalorder %s1012_s27, %s1370_s29  ;;  %p1376_p0 = scmp.lt.s32.totalorder %s1370_s29, %s1370_s29 }
  0x63   :  { %1112 = vmatmul.mubr.msk.bf16.vlgmr.msra.gmra.mrb[0].mxu1 %vm216_vm2, %v1199_v7 }
  0x64   :  { %1120 = vmatpush3.bf16.msra.mxu1 %v1200_v5  ;;  %1115 = vmatprep.mubr.msk.bf16.mxu1 %vm216_vm2, %v1203_v10  ;;  %p1377_p1 = por %p1376_p0, %p1375_p13 }
  0x65   :  { %1184 = vmatprep.subr.msk.bf16.mxu1 %vm229_vm1, %v1205_v11  ;;  %1104 = vmatmul.mubr.msk.bf16.vlgmr.msra.gmra.mrb[0].mxu0 %vm137_vm3, %v104_v12 }
  0x66   :  { %1132 = vmatpush3.bf16.msra.mxu0 %v1210_v16  ;;  %v1218_v16 = vld [vmem:[%s1685_s7] sm:$0xff]   ;;  %p1378_p2 = pnand %p1377_p1, %p1371_p12 }
  0x67   :  { %1133 = vmatprep.subr.bf16.mxu0 %v1211_v17 }
  0x68   :  { %1122 = vmatpush3.bf16.msra.mxu1 %v340_v14 }
  0x69   :  { %1155 = vmatprep.subr.bf16.mxu1 %v1407_v0 }
  0x6a   :  { %1134 = vmatpush3.bf16.msra.mxu0 %v1211_v17  ;;  %v1219_v17 = vld [vmem:[%s1685_s7 + $0x8] sm:$0xff]  }
  0x6b   :  { %1116 = vmatmul.mubr.msk.bf16.gmra.mrb[4].mxu1 %vm216_vm2, %v1204_v13  ;;  %1135 = vmatprep.subr.bf16.mxu0 %v1212_v18 }
  0x6c   :  { %1123 = vmatprep.mubr.msk.bf16.mxu1 %vm216_vm2, %v1206_v15 }
  0x6e   :  { %1136 = vmatpush3.bf16.msra.mxu0 %v1212_v18  ;;  %v1220_v18 = vld [vmem:[%s1685_s7 + $0x10] sm:$0xff]  }
  0x6f   :  { %1137 = vmatprep.subr.bf16.mxu0 %v1213_v20 }
  0x72   :  { %1138 = vmatpush3.bf16.msra.mxu0 %v1213_v20  ;;  %v1222_v20 = vld [vmem:[%s1685_s7 + $0x20] sm:$0xff]  }
  0x73   :  { %1124 = vmatmul.mubr.msk.bf16.vlgmr.msra.gmra.mrb[0].mxu1 %vm216_vm2, %v1207_v19  ;;  %1139 = vmatprep.subr.bf16.mxu0 %v1214_v23  ;;  %v1221_v19 = vld [vmem:[%s1685_s7 + $0x18] sm:$0xff]  }
  0x74   :  { %1127 = vmatprep.mubr.msk.bf16.mxu1 %vm216_vm2, %v1208_v21  ;;  %1156 = vmatpush3.bf16.msra.mxu1 %v1218_v16  ;;  %v1223_v21 = vld [vmem:[%s1685_s7 + $0x28] sm:$0xff]  }
  0x75   :  { %1157 = vmatprep.subr.bf16.mxu1 %v1407_v0 }
  0x76   :  { %1140 = vmatpush3.bf16.msra.mxu0 %v1214_v23  ;;  %v1225_v23 = vld [vmem:[%s1685_s7 + $0x38] sm:$0xff]  }
  0x77   :  { %1141 = vmatprep.subr.bf16.mxu0 %v1215_v24 }
  0x78   :  { %1158 = vmatpush3.bf16.msra.mxu1 %v1219_v17 }
  0x79   :  { %1159 = vmatprep.subr.bf16.mxu1 %v1407_v0 }
  0x7a   :  { %1142 = vmatpush3.bf16.msra.mxu0 %v1215_v24 }
  0x7b   :  { %1128 = vmatmul.mubr.msk.bf16.gmra.mrb[4].mxu1 %vm216_vm2, %v1209_v22  ;;  %1143 = vmatprep.subr.bf16.mxu0 %v1216_v25  ;;  %v1224_v22 = vld [vmem:[%s1685_s7 + $0x30] sm:$0xff]  }
  0x7c   :  { %1171 = vmatprep.mubr.msk.bf16.mxu1 %vm1408_vm0, %v1407_v0  ;;  %1160 = vmatpush3.bf16.msra.mxu1 %v1220_v18 }
  0x7d   :  { %1161 = vmatprep.subr.bf16.mxu1 %v1407_v0 }
  0x7e   :  { %1144 = vmatpush3.bf16.msra.mxu0 %v1216_v25 }
  0x7f   :  { %1145 = vmatprep.subr.bf16.mxu0 %v1217_v26 }
  0x80   :  { %1162 = vmatpush3.bf16.msra.mxu1 %v1221_v19 }
  0x81   :  { %1163 = vmatprep.subr.bf16.mxu1 %v1407_v0 }
  0x82   :  { %1146 = vmatpush3.bf16.msra.mxu0 %v1217_v26 }
  0x84   :  { %1164 = vmatpush3.bf16.msra.mxu1 %v1222_v20 }
  0x85   :  { %1165 = vmatprep.subr.bf16.mxu1 %v1407_v0 }
  0x88   :  { %1166 = vmatpush3.bf16.msra.mxu1 %v1223_v21 }
  0x89   :  { %1167 = vmatprep.subr.bf16.mxu1 %v1407_v0 }
  0x8c   :  { %1168 = vmatpush3.bf16.msra.mxu1 %v1224_v22 }
  0x8d   :  { %1169 = vmatprep.subr.bf16.mxu1 %v1407_v0 }
  0x90   :  { %1170 = vmatpush3.bf16.msra.mxu1 %v1225_v23 }
 0x138   :  { %v175_v33 = vpop.f32.mrb[0].mxu0 }
 0x139   :  { %v408_v34 = vcombine.high %v175_v33, %v175_v33  ;;  %v415_v35 = vrot.slane %v175_v33, %v414_v32  ;;  %v1105_v36 = vpop.f32.mrb[1].mxu0 }
 0x13a   :  { %v178_v37 = vpop.f32.mrb[2].mxu0 }
 0x13b   :  { %v423_v38 = vcombine.high %v415_v35, %v415_v35  ;;  %v431_v39 = vrot.slane %v415_v35, %v414_v32  ;;  %v1106_v40 = vpop.f32.mrb[3].mxu0  ;;  %v422_v41 = vrot.slane %v408_v34, %v414_v32 }
 0x13d   :  { %v445_v42 = vrot.slane %v423_v38, %v414_v32  ;;  %v453_v44 = vcombine.high %v431_v39, %v431_v39  ;;  %v424_v46 = vcombine.high %v422_v41, %v422_v41  ;;  %v460_v48 = vrot.slane %v431_v39, %v459_v43 }
 0x13e   :  { %v438_v49 = vrot.slane %v422_v41, %v414_v32 }
 0x13f   :  { %v455_v45 = vcombine.high %v445_v42, %v445_v42  ;;  %v468_v47 = vrot.slane %v453_v44, %v459_v43  ;;  %v464_v52 = vrot.slane %v445_v42, %v459_v43  ;;  %v452_v55 = vrot.slane %v424_v46, %v414_v32 }
 0x140   :  { %v454_v60 = vcombine.high %v438_v49, %v438_v49  ;;  %v476_v4 = vrot.slane %v438_v49, %v459_v43 }
 0x141   :  { %v472_v50 = vrot.slane %v455_v45, %v459_v43  ;;  %v456_v63 = vcombine.high %v452_v55, %v452_v55  ;;  %v480_v10 = vrot.slane %v452_v55, %v459_v43 }
 0x142   :  { %v484_v2 = vrot.slane %v454_v60, %v459_v43 }
 0x143   :  { %v488_v7 = vrot.slane %v456_v63, %v459_v43 }
 0x146   :  { %v1594_v51 = vpop.f32.mrb[0].mxu1 }
 0x147   :  { %v499_v53 = vmul.f32 %v1594_v51, %v468_v47  ;;  %v1597_v54 = vpop.f32.mrb[1].mxu1 }
 0x148   :  { %v497_v56 = vmul.f32 %v460_v48, %v1597_v54  ;;  %v1600_v57 = vpop.f32.mrb[2].mxu1 }
 0x149   :  { %v500_v58 = vmul.f32 %v1600_v57, %v472_v50  ;;  %v1603_v59 = vpop.f32.mrb[3].mxu1 }
 0x14a   :  { %v498_v61 = vmul.f32 %v464_v52, %v1603_v59 }
 0x14b   :  { %v506_v62 = vpack.c.bf16 %v500_v58, %v499_v53 }
 0x14c   :  { %v505_v1 = vpack.c.bf16 %v498_v61, %v497_v56 }
 0x14e   :  { %v1606_v3 = vpop.f32.mrb[4].mxu1  ;;  %1147 = vmatprep.mubr.bf16.mxu0 %v505_v1 }
 0x14f   :  { %v503_v5 = vmul.f32 %v1606_v3, %v484_v2  ;;  %v1609_v6 = vpop.f32.mrb[5].mxu1  ;;  %1148 = vmatmul.mubr.bf16.vlgmr.msra.gmra.mrb[4].mxu0 %v506_v62 }
 0x150   :  { %v501_v8 = vmul.f32 %v476_v4, %v1609_v6  ;;  %v1612_v9 = vpop.f32.mrb[6].mxu1 }
 0x151   :  { %v504_v11 = vmul.f32 %v1612_v9, %v488_v7  ;;  %v1615_v12 = vpop.f32.mrb[7].mxu1 }
 0x152   :  { %v502_v13 = vmul.f32 %v480_v10, %v1615_v12 }
 0x153   :  { %v508_v14 = vpack.c.bf16 %v504_v11, %v503_v5 }
 0x154   :  { %v507_v15 = vpack.c.bf16 %v502_v13, %v501_v8 }
 0x156   :  { %1151 = vmatprep.mubr.bf16.mxu0 %v507_v15 }
 0x157   :  { %1152 = vmatmul.mubr.bf16.gmra.mrb[8].mxu0 %v508_v14 }
 0x222   :  { %v1149_v24 = vpop.f32.mrb[4].mxu0 }
 0x223   :  { %v650_v25 = vrot.slane %v1149_v24, 4  ;;  %v607_v26 = vpop.f32.mrb[5].mxu0 }
 0x224   :  { %v638_v27 = vrot.slane %v607_v26, 4  ;;  %v1150_v28 = vpop.f32.mrb[6].mxu0 }
 0x225   :  { %v651_v29 = vmax.f32 %v1149_v24, %v650_v25  ;;  %v656_v30 = vrot.slane %v1150_v28, 4  ;;  %v610_v31 = vpop.f32.mrb[7].mxu0 }
 0x226   :  { %v639_v32 = vmax.f32 %v607_v26, %v638_v27  ;;  %v644_v33 = vrot.slane %v610_v31, 4 }
 0x227   :  { %v652_v34 = vrot.slane %v651_v29, 2  ;;  %v657_v35 = vmax.f32 %v1150_v28, %v656_v30 }
 0x228   :  { %v640_v36 = vrot.slane %v639_v32, 2  ;;  %v645_v37 = vmax.f32 %v610_v31, %v644_v33 }
 0x229   :  { %v653_v38 = vmax.f32 %v651_v29, %v652_v34  ;;  %v658_v39 = vrot.slane %v657_v35, 2 }
 0x22a   :  { %v641_v40 = vmax.f32 %v639_v32, %v640_v36  ;;  %v646_v41 = vrot.slane %v645_v37, 2  ;;  %v1153_v0 = vpop.f32.mrb[8].mxu0 }
 0x22b   :  { %v654_v42 = vrot.slane %v653_v38, 1  ;;  %v659_v43 = vmax.f32 %v657_v35, %v658_v39  ;;  %v674_v44 = vrot.slane %v1153_v0, 4  ;;  %v623_v45 = vpop.f32.mrb[9].mxu0 }
 0x22c   :  { %v642_v46 = vrot.slane %v641_v40, 1  ;;  %v647_v47 = vmax.f32 %v645_v37, %v646_v41  ;;  %v662_v48 = vrot.slane %v623_v45, 4  ;;  %v1154_v49 = vpop.f32.mrb[10].mxu0 }
 0x22d   :  { %v655_v50 = vmax.f32 %v653_v38, %v654_v42  ;;  %v660_v52 = vrot.slane %v659_v43, 1  ;;  %v675_v53 = vmax.f32 %v1153_v0, %v674_v44  ;;  %v680_v55 = vrot.slane %v1154_v49, 4  ;;  %v626_v56 = vpop.f32.mrb[11].mxu0 }
 0x22e   :  { %v643_v58 = vmax.f32 %v641_v40, %v642_v46  ;;  %v648_v60 = vrot.slane %v647_v47, 1  ;;  %v663_v61 = vmax.f32 %v623_v45, %v662_v48  ;;  %v668_v62 = vrot.slane %v626_v56, 4 }
 0x22f   :  { %v688_v63 = vsub.f32 %v1149_v24, %v655_v50  ;;  %v661_v1 = vmax.f32 %v659_v43, %v660_v52  ;;  %v676_v2 = vrot.slane %v675_v53, 2  ;;  %v681_v4 = vmax.f32 %v1154_v49, %v680_v55 }
 0x230   :  { %v686_v5 = vsub.f32 %v607_v26, %v643_v58  ;;  %v649_v7 = vmax.f32 %v647_v47, %v648_v60  ;;  %v664_v8 = vrot.slane %v663_v61, 2  ;;  %v669_v10 = vmax.f32 %v626_v56, %v668_v62 }
 0x231   :  { %v698_v11 = vmul.f32 1.442695, %v688_v63  ;;  %v689_v13 = vsub.f32 %v1150_v28, %v661_v1  ;;  %v677_v14 = vmax.f32 %v675_v53, %v676_v2  ;;  %v682_v15 = vrot.slane %v681_v4, 2 }
 0x232   :  { %v694_v16 = vmul.f32 1.442695, %v686_v5  ;;  %v687_v17 = vsub.f32 %v610_v31, %v649_v7  ;;  %v665_v18 = vmax.f32 %v663_v61, %v664_v8  ;;  %v670_v19 = vrot.slane %v669_v10, 2 }
 0x233   :  { %1226 = vpow2.f32 %v698_v11  ;;  %v700_v20 = vmul.f32 1.442695, %v689_v13  ;;  %v678_v21 = vrot.slane %v677_v14, 1  ;;  %v683_v22 = vmax.f32 %v681_v4, %v682_v15 }
 0x234   :  { %1228 = vpow2.f32 %v694_v16  ;;  %v696_v23 = vmul.f32 1.442695, %v687_v17  ;;  %v666_v24 = vrot.slane %v665_v18, 1  ;;  %v671_v25 = vmax.f32 %v669_v10, %v670_v19 }
 0x235   :  { %1230 = vpow2.f32 %v700_v20  ;;  %v679_v26 = vmax.f32 %v677_v14, %v678_v21  ;;  %v684_v27 = vrot.slane %v683_v22, 1 }
 0x236   :  { %1232 = vpow2.f32 %v696_v23  ;;  %v667_v29 = vmax.f32 %v665_v18, %v666_v24  ;;  %v672_v28 = vrot.slane %v671_v25, 1 }
 0x237   :  { %v692_v30 = vsub.f32 %v1153_v0, %v679_v26  ;;  %v685_v32 = vmax.f32 %v683_v22, %v684_v27 }
 0x238   :  { %v690_v33 = vsub.f32 %v623_v45, %v667_v29  ;;  %v673_v31 = vmax.f32 %v671_v25, %v672_v28 }
 0x239   :  { %v706_v34 = vmul.f32 1.442695, %v692_v30  ;;  %v693_v35 = vsub.f32 %v1154_v49, %v685_v32 }
 0x23a   :  { %v702_v36 = vmul.f32 1.442695, %v690_v33  ;;  %v691_v37 = vsub.f32 %v626_v56, %v673_v31 }
 0x23b   :  { %1234 = vpow2.f32 %v706_v34  ;;  %v708_v38 = vmul.f32 1.442695, %v693_v35 }
 0x23c   :  { %1236 = vpow2.f32 %v702_v36  ;;  %v704_v39 = vmul.f32 1.442695, %v691_v37 }
 0x23d   :  { %v1227_v40 = vpop.eup %1226  ;;  %1238 = vpow2.f32 %v708_v38 }
 0x23e   :  { %v1229_v41 = vpop.eup %1228  ;;  %v722_v42 = vrot.slane %v1227_v40, 4  ;;  %v760_v43 = vmul.f32 %v1227_v40, %v1594_v51  ;;  %1240 = vpow2.f32 %v704_v39 }
 0x23f   :  { %v1231_v44 = vpop.eup %1230  ;;  %v710_v46 = vrot.slane %v1229_v41, 4  ;;  %v758_v0 = vmul.f32 %v1229_v41, %v1597_v54 }
 0x240   :  { %v1233_v45 = vpop.eup %1232  ;;  %v723_v47 = vadd.f32 %v1227_v40, %v722_v42  ;;  %v778_v48 = vrot.slane %v760_v43, 4  ;;  %v728_v49 = vrot.slane %v1231_v44, 4  ;;  %v761_v50 = vmul.f32 %v1231_v44, %v1600_v57 }
 0x241   :  { %v711_v52 = vadd.f32 %v1229_v41, %v710_v46  ;;  %v766_v53 = vrot.slane %v758_v0, 4  ;;  %v716_v55 = vrot.slane %v1233_v45, 4  ;;  %v759_v56 = vmul.f32 %v1233_v45, %v1603_v59 }
 0x242   :  { %v724_v58 = vrot.slane %v723_v47, 2  ;;  %v779_v60 = vadd.f32 %v778_v48, %v760_v43  ;;  %v729_v51 = vadd.f32 %v1231_v44, %v728_v49  ;;  %v784_v61 = vrot.slane %v761_v50, 4 }
 0x243   :  { %v712_v62 = vrot.slane %v711_v52, 2  ;;  %v767_v63 = vadd.f32 %v766_v53, %v758_v0  ;;  %v717_v1 = vadd.f32 %v1233_v45, %v716_v55  ;;  %v772_v54 = vrot.slane %v759_v56, 4 }
 0x244   :  { %v725_v2 = vadd.f32 %v724_v58, %v723_v47  ;;  %v780_v4 = vrot.slane %v779_v60, 2  ;;  %v730_v5 = vrot.slane %v729_v51, 2  ;;  %v785_v7 = vadd.f32 %v784_v61, %v761_v50 }
 0x245   :  { %v1235_v8 = vpop.eup %1234  ;;  %v713_v10 = vadd.f32 %v712_v62, %v711_v52  ;;  %v768_v57 = vrot.slane %v767_v63, 2  ;;  %v718_v11 = vrot.slane %v717_v1, 2  ;;  %v773_v13 = vadd.f32 %v772_v54, %v759_v56 }
 0x246   :  { %v1237_v14 = vpop.eup %1236  ;;  %v726_v15 = vrot.slane %v725_v2, 1  ;;  %v731_v59 = vadd.f32 %v730_v5, %v729_v51  ;;  %v746_v16 = vrot.slane %v1235_v8, 4  ;;  %v764_v17 = vmul.f32 %v1235_v8, %v1606_v3 }
 0x247   :  { %v714_v18 = vrot.slane %v713_v10, 1  ;;  %v769_v19 = vadd.f32 %v768_v57, %v767_v63  ;;  %v719_v20 = vadd.f32 %v718_v11, %v717_v1  ;;  %v774_v21 = vrot.slane %v773_v13, 2  ;;  %v1239_v22 = vpop.eup %1238 }
 0x248   :  { %v727_v23 = vadd.f32 %v726_v15, %v725_v2  ;;  %v732_v24 = vrot.slane %v731_v59, 1  ;;  %v747_v25 = vadd.f32 %v1235_v8, %v746_v16  ;;  %v734_v26 = vrot.slane %v1237_v14, 4  ;;  %v1241_v27 = vpop.eup %1240 }
 0x249   :  { %v715_v29 = vadd.f32 %v714_v18, %v713_v10  ;;  %v720_v28 = vrot.slane %v719_v20, 1  ;;  %v775_v30 = vadd.f32 %v774_v21, %v773_v13  ;;  %v762_v32 = vmul.f32 %v1237_v14, %v1609_v6 }
 0x24a   :  { %1242 = vrcp.f32 %v727_v23  ;;  %v733_v33 = vadd.f32 %v732_v24, %v731_v59  ;;  %v748_v31 = vrot.slane %v747_v25, 2  ;;  %v735_v34 = vadd.f32 %v1237_v14, %v734_v26 }
 0x24b   :  { %1244 = vrcp.f32 %v715_v29  ;;  %v721_v3 = vadd.f32 %v720_v28, %v719_v20  ;;  %v790_v35 = vrot.slane %v762_v32, 4  ;;  %v752_v36 = vrot.slane %v1239_v22, 4 }
 0x24c   :  { %1246 = vrcp.f32 %v733_v33  ;;  %v749_v37 = vadd.f32 %v748_v31, %v747_v25  ;;  %v736_v38 = vrot.slane %v735_v34, 2  ;;  %v740_v39 = vrot.slane %v1241_v27, 4 }
 0x24d   :  { %1248 = vrcp.f32 %v721_v3  ;;  %v753_v40 = vadd.f32 %v1239_v22, %v752_v36  ;;  %v763_v41 = vmul.f32 %v1241_v27, %v1615_v12  ;;  %v765_v42 = vmul.f32 %v1239_v22, %v1612_v9 }
 0x24e   :  { %v750_v43 = vrot.slane %v749_v37, 1  ;;  %v737_v6 = vadd.f32 %v736_v38, %v735_v34  ;;  %v741_v44 = vadd.f32 %v1241_v27, %v740_v39  ;;  %v770_v46 = vrot.slane %v769_v19, 1 }
 0x24f   :  { %v754_v0 = vrot.slane %v753_v40, 2  ;;  %v796_v45 = vrot.slane %v763_v41, 4  ;;  %v776_v47 = vrot.slane %v775_v30, 1  ;;  %v781_v48 = vadd.f32 %v780_v4, %v779_v60 }
 0x250   :  { %v738_v49 = vrot.slane %v737_v6, 1  ;;  %v742_v50 = vrot.slane %v741_v44, 2  ;;  %v751_v52 = vadd.f32 %v750_v43, %v749_v37  ;;  %v771_v55 = vadd.f32 %v770_v46, %v769_v19 }
 0x251   :  { %v755_v53 = vadd.f32 %v754_v0, %v753_v40  ;;  %v782_v56 = vrot.slane %v781_v48, 1  ;;  %v786_v58 = vrot.slane %v785_v7, 2  ;;  %v791_v12 = vadd.f32 %v790_v35, %v762_v32 }
 0x252   :  { %v739_v51 = vadd.f32 %v738_v49, %v737_v6  ;;  %v743_v61 = vadd.f32 %v742_v50, %v741_v44  ;;  %v797_v62 = vadd.f32 %v796_v45, %v763_v41  ;;  %v777_v63 = vadd.f32 %v776_v47, %v775_v30 }
 0x253   :  { %v756_v9 = vrot.slane %v755_v53, 1  ;;  %v787_v1 = vadd.f32 %v786_v58, %v785_v7  ;;  %v802_v54 = vrot.slane %v764_v17, 4  ;;  %v792_v8 = vrot.slane %v791_v12, 2 }
 0x254   :  { %v1243_v2 = vpop.eup %1242  ;;  %1250 = vrcp.f32 %v739_v51  ;;  %v744_v5 = vrot.slane %v743_v61, 1  ;;  %v798_v60 = vrot.slane %v797_v62, 2  ;;  %v808_v13 = vrot.slane %v765_v42, 4 }
 0x255   :  { %v1245_v4 = vpop.eup %1244  ;;  %v757_v10 = vadd.f32 %v756_v9, %v755_v53  ;;  %v788_v57 = vrot.slane %v787_v1, 1  ;;  %v803_v11 = vadd.f32 %v802_v54, %v764_v17  ;;  %v783_v59 = vadd.f32 %v782_v56, %v781_v48 }
 0x256   :  { %v1247_v14 = vpop.eup %1246  ;;  %v745_v15 = vadd.f32 %v744_v5, %v743_v61  ;;  %v793_v16 = vadd.f32 %v792_v8, %v791_v12  ;;  %1252 = vrcp.f32 %v751_v52  ;;  %v799_v19 = vadd.f32 %v798_v60, %v797_v62 }
 0x257   :  { %v1249_v18 = vpop.eup %1248  ;;  %v804_v20 = vrot.slane %v803_v11, 2  ;;  %v809_v7 = vadd.f32 %v808_v13, %v765_v42  ;;  %1254 = vrcp.f32 %v757_v10  ;;  %v789_v21 = vadd.f32 %v788_v57, %v787_v1 }
 0x258   :  { %1256 = vrcp.f32 %v745_v15  ;;  %v794_v22 = vrot.slane %v793_v16, 1  ;;  %v822_v23 = vmul.f32 %v1245_v4, %v771_v55  ;;  %v823_v26 = vmul.f32 %v1249_v18, %v777_v63 }
 0x259   :  { %v805_v24 = vadd.f32 %v804_v20, %v803_v11  ;;  %v810_v25 = vrot.slane %v809_v7, 2  ;;  %v824_v27 = vmul.f32 %v1243_v2, %v783_v59  ;;  %v825_v17 = vmul.f32 %v1247_v14, %v789_v21  ;;  %v1061_v20 = vld [vmem:[%s1686_s8] ss:$0 sm:$0xff] }
 0x25a   :  { %v830_v29 = vpack.c.bf16 %v822_v23, %v822_v23  ;;  %v831_v32 = vpack.c.bf16 %v823_v26, %v823_v26  ;;  %v800_v31 = vrot.slane %v799_v19, 1  ;;  %v795_v3 = vadd.f32 %v794_v22, %v793_v16  ;;  %v1062_v21 = vld [vmem:[%s1687_s9] ss:$0 sm:$0xff] }
 0x25b   :  { %v806_v28 = vrot.slane %v805_v24, 1  ;;  %v811_v30 = vadd.f32 %v810_v25, %v809_v7  ;;  %v832_v33 = vpack.c.bf16 %v824_v27, %v824_v27  ;;  %v833_v34 = vpack.c.bf16 %v825_v17, %v825_v17 }
 0x25c   :  { %v862_v36 = vunpack.c.l.b16 %v830_v29  ;;  %v863_v37 = vunpack.c.l.b16 %v831_v32  ;;  %v801_v45 = vadd.f32 %v800_v31, %v799_v19 }
 0x25d   :  { %v812_v35 = vrot.slane %v811_v30, 1  ;;  %v864_v39 = vunpack.c.l.b16 %v832_v33  ;;  %v807_v40 = vadd.f32 %v806_v28, %v805_v24  ;;  %v865_v42 = vunpack.c.l.b16 %v833_v34 }
 0x25e   :  { %v1251_v38 = vpop.eup %1250  ;;  %v871_v43 = vsel %vm870_vm4, %v863_v37, %v862_v36 }
 0x25f   :  { %v826_v41 = vmul.f32 %v1251_v38, %v795_v3  ;;  %v813_v44 = vadd.f32 %v812_v35, %v811_v30  ;;  %v873_v46 = vsel %vm872_vm5, %v864_v39, %v871_v43 }
 0x260   :  { %v1253_v6 = vpop.eup %1252  ;;  %v875_v49 = vsel %vm874_vm6, %v865_v42, %v873_v46 }
 0x261   :  { %v1255_v0 = vpop.eup %1254  ;;  %v828_v47 = vmul.f32 %v1253_v6, %v807_v40  ;;  %v834_v48 = vpack.c.bf16 %v826_v41, %v826_v41 }
 0x262   :  { %v1257_v50 = vpop.eup %1256  ;;  %v829_v52 = vmul.f32 %v1255_v0, %v813_v44 }
 0x263   :  { %v827_v53 = vmul.f32 %v1257_v50, %v801_v45  ;;  %v866_v55 = vunpack.c.l.b16 %v834_v48  ;;  %v836_v56 = vpack.c.bf16 %v828_v47, %v828_v47 }
 0x264   :  { %v837_v51 = vpack.c.bf16 %v829_v52, %v829_v52 }
 0x265   :  { %v835_v58 = vpack.c.bf16 %v827_v53, %v827_v53  ;;  %v877_v61 = vsel %vm876_vm7, %v866_v55, %v875_v49  ;;  %v868_v62 = vunpack.c.l.b16 %v836_v56 }
 0x266   :  { %v869_v9 = vunpack.c.l.b16 %v837_v51 }
 0x267   :  { %v867_v12 = vunpack.c.l.b16 %v835_v58 }
 0x269   :  { %v879_v63 = vsel %vm878_vm8, %v867_v12, %v877_v61 }
 0x26a   :  { %v881_v1 = vsel %vm880_vm9, %v868_v62, %v879_v63 }
 0x26b   :  { %v883_v54 = vsel %vm882_vm10, %v869_v9, %v881_v1 }
 0x26c   :  { %v884_v2 = vpack.c.b16 %v883_v54, %v883_v54 }
 0x26e   :  { %1172 = vmatmul.mubr.bf16.vlgmr.msra.gmra.mrb[8].mxu1 %v884_v2 }
 0x341   :  { %v968_v5 = vpop.f32.mrb[8].mxu1 }
 0x342   :  { %v1173_v8 = vpop.f32.mrb[9].mxu1  ;;  %v974_v60 = vsel %vm137_vm3, %v968_v5, 0.0 }
 0x343   :  { %975 = vadd.xlane.f32.xlu0 %v974_v60  ;;  %v971_v4 = vpop.f32.mrb[10].mxu1 }
 0x344   :  { %v1174_v10 = vpop.f32.mrb[11].mxu1 }
 0x3d0   :  { %v976_v57 = vpop.xlane.xlu0 %975 }
 0x3d1   :  { %v978_v11 = vmul.f32 0.03125, %v976_v57 }
 0x3d3   :  { %v979_v13 = vsub.f32 %v968_v5, %v978_v11 }
 0x3d5   :  { %v980_v14 = vmul.f32 %v979_v13, %v979_v13 }
 0x3d7   :  { %v981_v15 = vsel %vm137_vm3, %v980_v14, 0.0 }
 0x3d8   :  { %982 = vadd.xlane.f32.xlu0 %v981_v15 }
 0x465   :  { %v983_v59 = vpop.xlane.xlu0 %982 }
 0x466   :  { %v984_v16 = vmul.f32 0.03125, %v983_v59 }
 0x468   :  { %v985_v18 = vadd.f32 1e-06, %v984_v16 }
 0x46a   :  { %1258 = vrsqrt.f32 %v985_v18 }
 0x474   :  { %v1259_v19 = vpop.eup %1258 }
 0x475   :  { %v987_v7 = vmul.f32 %v1259_v19, %v979_v13 }
 0x477   :  { %v995_v22 = vmul.f32 %v1061_v20, %v987_v7 }
 0x479   :  { %v1003_v23 = vadd.f32 %v1062_v21, %v995_v22 }
 0x47b   :  { %1004 = vst.msk [vmem:[#allocation11] sm:$0xff] %vm137_vm3, %v1003_v23 }
 0x47c   :  { %1381 = shalt.err (!%p1378_p2)
}
 0x47d   :  { %s1382_s4 = scalar_lea.hbm %s1688_s10, 128 }
 0x47e   :  { %p1383_p3 = scmp.ne.s32.totalorder %s1688_s10, %s1382_s4  ;;  %p1386_p4 = scmp.lt.u32.totalorder %s1382_s4, %s1688_s10 }
 0x480   :  { %p1388_p5 = pnand %p1386_p4, %p1383_p3 }
 0x482   :  { %1391 = shalt.err (!%p1388_p5)
}
 0x483   :  { %1014 = dma.vmem_to_hbm [thread:$0]  %s1012_s27, 128, %s1688_s10, [#allocation4]  }
 0x484   :  { %1398 = dma.done.wait [#allocation4], 128  }
 0x485   :  { %1399 = vsyncadd [#allocation4], 4294967168 }
 0x486   :  { %1018 = vsyncpa [#allocation3], 1 }
 0x487   :  { %1019 = vsyncpa [#allocation6], 1 }
 0x488   :  { %1020 = vsyncpa [#allocation9], 1 }
 0x489   :  { %1021 = vsyncpa [#allocation4], 1 }

</bundles_post_ra>
